<compile_context>
chip_gen: v6e
topology: v6e:2x2x1
jax: 0.10.0
libtpu: 0.0.40
codegen_flags: <defaults>
</compile_context>

<pallas_src>
import jax
import jax.numpy as jnp
from jax.experimental import pallas as pl
from jax.experimental.pallas import tpu as pltpu


def _round_up(n: int, m: int) -> int:
    return ((n + m - 1) // m) * m


def _linear_kernel(x_ref, w_ref, b_ref, o_ref):
    # x_ref: [TILE_B, K], w_ref: [K, N_pad], b_ref: [1, N_pad] (f32), o_ref: [TILE_B, N_pad]
    x = x_ref[...]
    w = w_ref[...]
    if x.dtype != w.dtype:
        # In-kernel cast (VMEM -> vreg, hidden under the MXU) instead of a wrapper-side
        # HBM round trip of x.
        x = x.astype(w.dtype)
    acc = jnp.dot(x, w, preferred_element_type=jnp.float32)
    o_ref[...] = (acc + b_ref[...]).astype(o_ref.dtype)


def prepare_linear_params(weight, bias, *, lane: int = 128, compute_dtype=None,
                          padded_lane_bias: float = 0.0):
    """One-time parameter prep (the 'init' step).

    weight: [num_outputs, num_inputs]  (PyTorch nn.Linear convention)
    bias:   [num_outputs]
    Returns (w_kn_pad [num_inputs, N_pad], b_pad [1, N_pad] f32): pre-transposed,
    lane-padded to a multiple of 128 and (optionally) cast to compute_dtype ONCE, so the
    per-call kernel never transposes / casts / re-pads the weight.
    padded_lane_bias: value for the padded bias lanes (use -1e9 + return_padded=True if the
    padded logits feed a softmax directly).
    """
    num_outputs, num_inputs = weight.shape
    n_pad = _round_up(num_outputs, lane)
    w_t = weight.T
    if compute_dtype is not None:
        w_t = w_t.astype(compute_dtype)
    w_kn = jnp.zeros((num_inputs, n_pad), w_t.dtype).at[:, :num_outputs].set(w_t)
    b_pad = jnp.full((1, n_pad), padded_lane_bias, jnp.float32).at[0, :num_outputs].set(
        bias.astype(jnp.float32))
    return w_kn, b_pad


def _vmem_limit_bytes() -> int:
    """Generation-aware VMEM limit (3/4 of physical; conservative 64 MiB if unknown)."""
    cap = None
    try:
        info = pltpu.get_tpu_info()
        cap = getattr(info, "vmem_capacity_bytes", None)
    except Exception:
        cap = None
    if not cap:
        cap = 64 << 20  # v7x physical per-core VMEM (smallest current generation)
    return int(cap) * 3 // 4


def _pallas_linear(x, w_kn_pad, b_pad, out_dtype, tile_b_eff, grid, vmem_limit, cost,
                   buffered):
    B, K = x.shape
    _, N_pad = w_kn_pad.shape
    if buffered:
        # Constant index_map => fetched once; single buffer halves their VMEM footprint.
        w_spec = pl.BlockSpec((K, N_pad), lambda i: (0, 0), pipeline_mode=pl.Buffered(1))
        b_spec = pl.BlockSpec((1, N_pad), lambda i: (0, 0), pipeline_mode=pl.Buffered(1))
    else:
        w_spec = pl.BlockSpec((K, N_pad), lambda i: (0, 0))
        b_spec = pl.BlockSpec((1, N_pad), lambda i: (0, 0))
    return pl.pallas_call(
        _linear_kernel,
        out_shape=jax.ShapeDtypeStruct((B, N_pad), out_dtype),
        grid=grid,
        in_specs=[
            pl.BlockSpec((tile_b_eff, K), lambda i: (i, 0)),   # x streams over batch tiles
            w_spec,                                            # weight stays resident
            b_spec,                                            # bias stays resident
        ],
        out_specs=pl.BlockSpec((tile_b_eff, N_pad), lambda i: (i, 0)),
        compiler_params=pltpu.CompilerParams(
            dimension_semantics=("parallel",),
            vmem_limit_bytes=int(vmem_limit),
        ),
        cost_estimate=cost,
    )(x, w_kn_pad, b_pad)


def linear_actor_head(x, w_kn_pad, b_pad, num_outputs, *,
                      tile_b: int = 1024,
                      vmem_limit_bytes=None,
                      force_pallas: bool = False,
                      return_padded: bool = False):
    """y = x @ weight.T + bias  (nn.Linear semantics), using pre-padded params.

    x:         [B, num_inputs]
    w_kn_pad:  [num_inputs, N_pad]   (from prepare_linear_params; may be bf16)
    b_pad:     [1, N_pad]  float32
    Returns    [B, num_outputs] in x's dtype (or [B, N_pad] if return_padded).
    """
    B, K = x.shape
    K_w, N_pad = w_kn_pad.shape
    assert K_w == K, (K_w, K)
    assert b_pad.shape == (1, N_pad), (b_pad.shape, N_pad)
    out_dtype = x.dtype

    # Small-shape fast path: at tiny sizes the pallas_call is pure fixed overhead.
    if not force_pallas and B * K * N_pad <= (1 << 16):
        acc = jnp.dot(x.astype(w_kn_pad.dtype), w_kn_pad,
                      preferred_element_type=jnp.float32)
        y = (acc + b_pad).astype(out_dtype)
        return y if return_padded else y[:, :num_outputs]

    if vmem_limit_bytes is None:
        vmem_limit_bytes = _vmem_limit_bytes()
    # Tile budget: leave a few MiB under the limit for internal scratch / bookkeeping.
    budget = max(int(vmem_limit_bytes) - (4 << 20), 4 << 20)

    x_item = x.dtype.itemsize
    w_item = w_kn_pad.dtype.itemsize
    o_item = jnp.dtype(out_dtype).itemsize

    resident = K * N_pad * w_item + N_pad * 4            # weight + bias (single-buffered)
    per_row = 2 * (K * x_item + N_pad * o_item)          # double-buffered x / out tiles
    max_tile = max(8, ((budget - resident) // per_row) // 8 * 8)
    tile_clamped = max(8, min(tile_b, max_tile, _round_up(B, 8)))

    # Balanced tiles: avoid the "B slightly above a tile multiple" ~2x waste pathology.
    num_tiles = pl.cdiv(B, tile_clamped)
    if num_tiles == 1 and B >= 16:
        num_tiles = 2                 # give both v7x TensorCores work; ~free on v5e/v6e
    tile_b_eff = _round_up(pl.cdiv(B, num_tiles), 8)
    grid = (pl.cdiv(B, tile_b_eff),)  # partial last block handled (masked) by Pallas

    bytes_accessed = (x.size * x_item + w_kn_pad.size * w_item
                      + b_pad.size * 4 + B * N_pad * o_item)
    cost = pl.CostEstimate(flops=2 * B * K * N_pad, transcendentals=0,
                           bytes_accessed=bytes_accessed)

    try:
        out = _pallas_linear(x, w_kn_pad, b_pad, out_dtype, tile_b_eff, grid,
                             vmem_limit_bytes, cost, buffered=True)
    except Exception:
        # Fallback if this JAX build rejects pipeline_mode=pl.Buffered(1).
        out = _pallas_linear(x, w_kn_pad, b_pad, out_dtype, tile_b_eff, grid,
                             vmem_limit_bytes, cost, buffered=False)

    return out if return_padded else out[:, :num_outputs]


def orthogonal_init(key, shape, gain=0.01, dtype=jnp.float32):
    """Deterministic equivalent of nn.init.orthogonal_(w, gain) for a 2-D weight."""
    rows, cols = shape
    a = jax.random.normal(key, (max(rows, cols), min(rows, cols)), dtype=jnp.float32)
    q, r = jnp.linalg.qr(a)
    d = jnp.sign(jnp.diagonal(r))
    q = q * d[None, :]
    if rows < cols:
        q = q.T
    return (gain * q[:rows, :cols]).astype(dtype)


if __name__ == "__main__":
    num_inputs = 32
    num_outputs = 16
    batch = 20   # deliberately NOT a tile multiple: exercises the masked partial block

    key = jax.random.PRNGKey(0)
    k_x, k_w = jax.random.split(key)

    x = jax.random.normal(k_x, (batch, num_inputs), dtype=jnp.float32)
    weight = orthogonal_init(k_w, (num_outputs, num_inputs), gain=0.01)  # nn.Linear weight
    bias = jnp.zeros((num_outputs,), dtype=jnp.float32)                  # constant_(bias, 0)

    y_ref = x @ weight.T + bias

    # One-time param prep (pre-transpose + pad N to 128 lanes), f32 path.
    w_f32, b_f32 = prepare_linear_params(weight, bias)
    y = linear_actor_head(x, w_f32, b_f32, num_outputs, force_pallas=True)
    jax.block_until_ready(y)
    assert y.shape == (batch, num_outputs)
    assert jnp.allclose(y, y_ref, atol=1e-5, rtol=1e-5)

    # bf16-weight compute path: weight cast once at init, x cast inside the kernel,
    # f32 MXU accumulation + f32 bias add.  tile_b=8 forces a multi-step grid.
    w_bf16, b_bf16 = prepare_linear_params(weight, bias, compute_dtype=jnp.bfloat16)
    y_bf16 = linear_actor_head(x, w_bf16, b_bf16, num_outputs, tile_b=8,
                               force_pallas=True)
    jax.block_until_ready(y_bf16)
    assert y_bf16.shape == (batch, num_outputs)
    assert jnp.allclose(y_bf16, y_ref, atol=1e-3, rtol=5e-2)

    # Small-shape fast path (bypasses pallas_call; fixed overhead dominates there).
    x_small = x[:4]
    y_small = linear_actor_head(x_small, w_f32, b_f32, num_outputs)
    jax.block_until_ready(y_small)
    assert jnp.allclose(y_small, y_ref[:4], atol=1e-5, rtol=1e-5)

    print("KERNEL_OK")
</pallas_src>

<mosaic_0001>
module attributes {stable_mosaic.version = 11 : i64} {
  func.func @_linear_kernel(%arg0: i32, %arg1: memref<16x32xf32, #tpu.memory_space<vmem>>, %arg2: memref<32x128xf32, #tpu.memory_space<vmem>>, %arg3: memref<1x128xf32, #tpu.memory_space<vmem>>, %arg4: memref<16x128xf32, #tpu.memory_space<vmem>>) attributes {dimension_semantics = [#tpu.dimension_semantics<parallel>], iteration_bounds = array<i64: 2>, scalar_prefetch = 0 : i64, scratch_operands = 0 : i64, tpu.core_type = #tpu.core_type<tc>, window_params = [{transform_indices = @transform_0, window_bounds = array<i64: 16, 32>}, {pipeline_mode = #tpu.pipeline_mode<synchronous>, transform_indices = @transform_1, window_bounds = array<i64: 32, 128>}, {pipeline_mode = #tpu.pipeline_mode<synchronous>, transform_indices = @transform_2, window_bounds = array<i64: 1, 128>}, {transform_indices = @transform_3, window_bounds = array<i64: 16, 128>}]} {
    %c0 = arith.constant 0 : index
    %c0_0 = arith.constant 0 : index
    %0 = vector.load %arg1[%c0, %c0_0] : memref<16x32xf32, #tpu.memory_space<vmem>>, vector<16x32xf32>
    %c0_1 = arith.constant 0 : index
    %c0_2 = arith.constant 0 : index
    %1 = vector.load %arg2[%c0_1, %c0_2] : memref<32x128xf32, #tpu.memory_space<vmem>>, vector<32x128xf32>
    %cst = arith.constant dense<0.000000e+00> : vector<16x128xf32>
    %2 = tpu.matmul %0, %1, %cst {dimension_numbers = #tpu.dot_dimension_numbers<[1], [0], [0], [1], [0, 0, 1, 1], [], []>} : vector<16x32xf32>, vector<32x128xf32>, vector<16x128xf32> -> vector<16x128xf32>
    %c0_3 = arith.constant 0 : index
    %c0_4 = arith.constant 0 : index
    %3 = vector.load %arg3[%c0_3, %c0_4] : memref<1x128xf32, #tpu.memory_space<vmem>>, vector<1x128xf32>
    %4 = vector.broadcast %3 : vector<1x128xf32> to vector<16x128xf32>
    %5 = arith.addf %2, %4 : vector<16x128xf32>
    %c0_5 = arith.constant 0 : index
    %c0_6 = arith.constant 0 : index
    %6 = vector.load %arg4[%c0_5, %c0_6] : memref<16x128xf32, #tpu.memory_space<vmem>>, vector<16x128xf32>
    tpu.vector_store %arg4[%c0_5, %c0_6], %5 {strides = array<i32>} : memref<16x128xf32, #tpu.memory_space<vmem>>, vector<16x128xf32>,
    return
  }
  func.func @transform_0(%arg0: i32) -> (i32, i32) {
    %c0_i32 = arith.constant 0 : i32
    %c0_i32_0 = arith.constant 0 : i32
    return %arg0, %c0_i32 : i32, i32
  }
  func.func @transform_1(%arg0: i32) -> (i32, i32) {
    %c0_i32 = arith.constant 0 : i32
    %c0_i32_0 = arith.constant 0 : i32
    %c0_i32_1 = arith.constant 0 : i32
    return %c0_i32, %c0_i32_0 : i32, i32
  }
  func.func @transform_2(%arg0: i32) -> (i32, i32) {
    %c0_i32 = arith.constant 0 : i32
    %c0_i32_0 = arith.constant 0 : i32
    %c0_i32_1 = arith.constant 0 : i32
    return %c0_i32, %c0_i32_0 : i32, i32
  }
  func.func @transform_3(%arg0: i32) -> (i32, i32) {
    %c0_i32 = arith.constant 0 : i32
    %c0_i32_0 = arith.constant 0 : i32
    return %arg0, %c0_i32 : i32, i32
  }
}

module attributes {stable_mosaic.version = 11 : i64} {
  func.func @_linear_kernel(%arg0: i32, %arg1: memref<16x32xf32, #tpu.memory_space<vmem>>, %arg2: memref<32x128xf32, #tpu.memory_space<vmem>>, %arg3: memref<1x128xf32, #tpu.memory_space<vmem>>, %arg4: memref<16x128xf32, #tpu.memory_space<vmem>>) attributes {dimension_semantics = [#tpu.dimension_semantics<parallel>], iteration_bounds = array<i64: 2>, scalar_prefetch = 0 : i64, scratch_operands = 0 : i64, tpu.core_type = #tpu.core_type<tc>, window_params = [{transform_indices = @transform_0, window_bounds = array<i64: 16, 32>}, {pipeline_mode = #tpu.pipeline_mode<synchronous>, transform_indices = @transform_1, window_bounds = array<i64: 32, 128>}, {pipeline_mode = #tpu.pipeline_mode<synchronous>, transform_indices = @transform_2, window_bounds = array<i64: 1, 128>}, {transform_indices = @transform_3, window_bounds = array<i64: 16, 128>}]} {
    %c0 = arith.constant 0 : index
    %c0_0 = arith.constant 0 : index
    %0 = vector.load %arg1[%c0, %c0_0] : memref<16x32xf32, #tpu.memory_space<vmem>>, vector<16x32xf32>
    %c0_1 = arith.constant 0 : index
    %c0_2 = arith.constant 0 : index
    %1 = vector.load %arg2[%c0_1, %c0_2] : memref<32x128xf32, #tpu.memory_space<vmem>>, vector<32x128xf32>
    %cst = arith.constant dense<0.000000e+00> : vector<16x128xf32>
    %2 = tpu.matmul %0, %1, %cst {dimension_numbers = #tpu.dot_dimension_numbers<[1], [0], [0], [1], [0, 0, 1, 1], [], []>} : vector<16x32xf32>, vector<32x128xf32>, vector<16x128xf32> -> vector<16x128xf32>
    %c0_3 = arith.constant 0 : index
    %c0_4 = arith.constant 0 : index
    %3 = vector.load %arg3[%c0_3, %c0_4] : memref<1x128xf32, #tpu.memory_space<vmem>>, vector<1x128xf32>
    %4 = vector.broadcast %3 : vector<1x128xf32> to vector<16x128xf32>
    %5 = arith.addf %2, %4 : vector<16x128xf32>
    %c0_5 = arith.constant 0 : index
    %c0_6 = arith.constant 0 : index
    %6 = vector.load %arg4[%c0_5, %c0_6] : memref<16x128xf32, #tpu.memory_space<vmem>>, vector<16x128xf32>
    tpu.vector_store %arg4[%c0_5, %c0_6], %5 {strides = array<i32>} : memref<16x128xf32, #tpu.memory_space<vmem>>, vector<16x128xf32>,
    return
  }
  func.func @transform_0(%arg0: i32) -> (i32, i32) {
    %c0_i32 = arith.constant 0 : i32
    %c0_i32_0 = arith.constant 0 : i32
    return %arg0, %c0_i32 : i32, i32
  }
  func.func @transform_1(%arg0: i32) -> (i32, i32) {
    %c0_i32 = arith.constant 0 : i32
    %c0_i32_0 = arith.constant 0 : i32
    %c0_i32_1 = arith.constant 0 : i32
    return %c0_i32, %c0_i32_0 : i32, i32
  }
  func.func @transform_2(%arg0: i32) -> (i32, i32) {
    %c0_i32 = arith.constant 0 : i32
    %c0_i32_0 = arith.constant 0 : i32
    %c0_i32_1 = arith.constant 0 : i32
    return %c0_i32, %c0_i32_0 : i32, i32
  }
  func.func @transform_3(%arg0: i32) -> (i32, i32) {
    %c0_i32 = arith.constant 0 : i32
    %c0_i32_0 = arith.constant 0 : i32
    return %arg0, %c0_i32 : i32, i32
  }
}

</mosaic_0001>

<bundles_post_ra>
// kernel: tpu_custom_call.1
= control target key start
LH: loop header
LB: loop body
LE: loop exit
PB: predicated region body
PF: predicated region fallthrough
CT: control target
= control target key end

     0   :  { %8 = vsyncpa [#allocation3], 0  ;;  %s871_s0 = inlined_call_operand.hbm [shape: f32[20,32], index: 0, kind: input, shape index: {}]   ;;  %s872_s1 = inlined_call_operand.hbm [shape: f32[32,128], index: 1, kind: input, shape index: {}]   ;;  %s873_s2 = inlined_call_operand.vmem [shape: f32[1,128], index: 2, kind: input, shape index: {}]   ;;  %s874_s3 = inlined_call_operand.hbm [shape: f32[20,128], index: 3, kind: output, shape index: {}]  }
   0x1   :  { %10 = vsyncpa [#allocation3 + $0x1], 0 }
   0x2   :  { %11 = vsyncpa [#allocation6], 0 }
   0x3   :  { %12 = vsyncpa [#allocation4], 0 }
   0x4   :  { %14 = vsyncpa [#allocation4 + $0x1], 0  ;;  %s673_s12 = smov 0   ;;  %s675_s13 = smov 0  }
   0x5   :  { %s677_s14 = smov 0   ;;  %s679_s15 = smov 0  }
   0x6 LB: > { %s694_s16 = sadd.s32 4294967295, %s642_s15   ;;  %s420_s17 = sadd.s32 4294967294, %s642_s15   ;;  %s642_s15 = sphi %s679_s15, %s889_s15   ;;  %s638_s14 = sphi %s677_s14, %s888_s14   ;;  %s634_s13 = sphi %s675_s13, %s887_s13   ;;  %s630_s12 = sphi %s673_s12, %s886_s12  }
   0x7   : > { %s698_s18 = sadd.s32 1, %s642_s15   ;;  %s27_s19 = sadd.s32 1, %s638_s14 }
   0x8   : > { %s24_s20 = ssub.s32 %s642_s15, %s698_s18  ;;  %p34_p0 = scmp.ne.s32.totalorder %s638_s14, %s634_s13 }
   0x9   : > { %p25_p1 = scmp.eq.s32.totalorder %s24_s20, 0  ;;  %p35_p2 = scmp.eq.s32.totalorder %s642_s15, 0 }
   0xa   : > { %p40_p3 = scmp.ne.s32.totalorder %s634_s13, %s630_s12  ;;  %p41_p4 = scmp.eq.s32.totalorder %s694_s16, 0 }
   0xb   : > { %s710_s21 = scalar_select %p25_p1, %s638_s14, %s27_s19  }
   0xc   : > { %p712_p5 = por %p35_p2, %p34_p0  ;;  %p718_p6 = por %p41_p4, %p40_p3 }
   0xd   : > { %p106_p7 = scmp.eq.s32.totalorder %s694_s16, 1  ;;  %p112_p8 = scmp.eq.s32.totalorder %s420_s17, 1 }
   0xe   : > { %s878_s23 = scalar_select %p718_p6, 1, 0 }
   0xf   : > { %p421_p9 = scmp.ge.s32.totalorder %s642_s15, 1  ;;  %p119_p10 = scmp.lt.s32.totalorder %s642_s15, 3 }
  0x10   : > { %p725_p11 = por %p106_p7, %p34_p0  ;;  %p729_p12 = por %p112_p8, %p40_p3 }
  0x11   : > { %p733_p13 = pnand %p421_p9, %p119_p10  ;;  %s644_s27 = smov [#allocation5]  }
  0x12   : > { %s879_s24 = scalar_select %p725_p11, 1, 0 }
  0x13   : > { %s880_s25 = scalar_select %p729_p12, 1, 0 }
  0x14   : > { %p472_p1 = pneg %p733_p13  ;;  %s131_s28 = sshll.u32 %s644_s27, 4  ;;  %s132_s28 = int_to_ptr.vmem [resolvable:$true] %s131_s28 }
  0x15   : > { %s533_s29 = scalar_lea.vmem %s132_s28, 512  ;;  %p541_p8 = scmp.lt.s32.totalorder %s132_s28, %s132_s28 }
  0x16   : > { %p473_p2 = pnand %p472_p1, %p41_p4  ;;  %p534_p7 = scmp.ne.s32.totalorder %s132_s28, %s533_s29 }
  0x17   : > { %p542_p6 = scmp.lt.s32.totalorder %s533_s29, %s533_s29 }
  0x18   : > { %p524_p0 = pneg %p473_p2 }
  0x19   : > { %p543_p12 = por %p542_p6, %p541_p8 }
  0x1a   : > { %p536_p11 = pnand %p534_p7, %p524_p0 }
  0x1c   : > { %p537_p3 = pneg %p536_p11 }
  0x1e   : > { %p544_p9 = pnand %p543_p12, %p537_p3 }
  0x20   : > { %547 = shalt.err (!%p544_p9)
}
  0x21   : > { %s645_s30 = smov 128   ;;  %s646_s4 = smov 8  }
  0x22   : > { %475 = dma.hbm_to_vmem [thread:$0]  (!%p473_p2), %s872_s1, 512, %s132_s28, [#allocation6], %s645_s30, %s645_s30, %s646_s4  }
  0x23   : > { %p876_p10 = scmp.ge.s32.totalorder %s642_s15, 2 }
  0x25   : > { %144 = sbr.rel (%p876_p10) target bundleno = 74 (0x4a), region = 24 }
  0x2a   : > { %147 = sbr.rel (!%p712_p5) target bundleno = 74 (0x4a), region = 28  ;;  %s148_s7 = sand.u32 (%p712_p5), 1, %s638_s14  }
  0x2b   : > { %s425_s8 = sshll.u32 (%p712_p5), %s642_s15, 1  ;;  %s424_s9 = sshll.u32 (%p712_p5), %s148_s7, 4 }
  0x2c   : > { %s154_s10 = ssub.s32 (%p712_p5), 3, %s425_s8  ;;  %s754_s19 = scalar_lea.sflag (%p712_p5), [#allocation3], %s148_s7 }
  0x2d   : > { %p155_p6 = scmp.lt.s32.totalorder (%p712_p5), %s154_s10, 2  ;;  %s152_s20 = scalar_lea.vmem (%p712_p5), [#allocation2], %s424_s9 }
  0x2f   : > { %s891_s10 = smov (!%p155_p6, %s154_s10), 2 }
  0x30   : > { %s751_s11 = sshll.u32 %s891_s10, 7 }
  0x31   : > { %s159_s17 = ssub.s32 256, %s751_s11 }
  0x32   : > { %160 = vsyncadd %s754_s19, %s159_s17  ;;  %p427_p5 = scmp.ne.s32.totalorder %s751_s11, 0  ;;  %s447_s22 = sshll.u32 %s642_s15, 8 }
  0x33   : > { %s762_s29 = scalar_lea.hbm %s871_s0, %s447_s22  ;;  %s165_s30 = sshll.u32 %s152_s20, 4  ;;  %s764_s30 = int_to_ptr.vmem [resolvable:$true] %s165_s30 }
  0x34   : > { %s548_s4 = scalar_lea.hbm %s762_s29, %s751_s11  ;;  %s552_s7 = scalar_lea.hbm %s871_s0, 384 }
  0x35   : > { %p549_p11 = scmp.ne.s32.totalorder %s762_s29, %s548_s4  ;;  %p553_p2 = scmp.lt.s32.totalorder %s762_s29, %s871_s0 }
  0x36   : > { %p554_p0 = scmp.lt.s32.totalorder %s552_s7, %s548_s4 }
  0x37   : > { %p550_p12 = pnand %p549_p11, %p427_p5 }
  0x38   : > { %p555_p7 = por %p554_p0, %p553_p2 }
  0x39   : > { %p551_p1 = pneg %p550_p12 }
  0x3b   : > { %p556_p3 = pnand %p555_p7, %p551_p1 }
  0x3d   : > { %559 = shalt.err (!%p556_p3)
}
  0x3e   : > { %s560_s10 = scalar_lea.vmem %s764_s30, %s751_s11  ;;  %s647_s17 = smov [#allocation2]  }
  0x3f   : > { %p561_p8 = scmp.ne.s32.totalorder %s764_s30, %s560_s10  ;;  %s564_s20 = sshll.u32 %s647_s17, 4  ;;  %s565_s20 = int_to_ptr.vmem [resolvable:$false] %s564_s20 }
  0x40   : > { %s566_s22 = scalar_lea.vmem %s565_s20, 512  ;;  %p567_p11 = scmp.lt.s32.totalorder %s764_s30, %s565_s20 }
  0x41   : > { %p562_p9 = pnand %p561_p8, %p427_p5  ;;  %p568_p12 = scmp.lt.s32.totalorder %s566_s22, %s560_s10 }
  0x43   : > { %p563_p6 = pneg %p562_p9  ;;  %p569_p10 = por %p568_p12, %p567_p11 }
  0x45   : > { %p570_p2 = pnand %p569_p10, %p563_p6 }
  0x47   : > { %573 = shalt.err (!%p570_p2)
}
  0x48   : > { %s648_s27 = smov 128   ;;  %s649_s28 = smov 8  }
  0x49   : > { %171 = dma.hbm_to_vmem [thread:$0]  (%p427_p5), %s762_s29, %s751_s11, %s764_s30, %s754_s19, %s648_s27, %s648_s27, %s649_s28  }
  0x4a PF: > { %177 = sbr.rel (%p733_p13) target bundleno = 316 (0x13c), region = 32  ;;  %s793_s4 = sand.u32 (!%p733_p13), 1, %s634_s13  }
  0x4b   : > { %s432_s5 = sshll.u32 (!%p733_p13), %s793_s4, 4  ;;  %s180_s6 = scalar_lea.sflag (!%p733_p13), [#allocation3], %s793_s4 }
  0x4c   : > { %s183_s7 = scalar_lea.vmem (!%p733_p13), [#allocation2], %s432_s5  ;;  %p882_p10 = scmp.ne.s32.totalorder (!%p733_p13), %s878_s23, 0 }
  0x4f   : > { %617 = dma.done.wait (%p882_p10), %s180_s6, 256  }
  0x50   : > { %619 = vsyncadd (%p882_p10), %s180_s6, 4294967040 }
  0x51   : > { %621 = dma.done.wait (%p41_p4), [#allocation6], 512  }
  0x52   : > { %623 = vsyncadd (%p41_p4), [#allocation6], 4294966784  ;;  %vm233_vm0 = vcmask 261120   ;;  %v225_v0 = vld [vmem:[#allocation5 + $0x18] sm:$0xff]  ;;  %v224_v1 = vld [vmem:[#allocation5 + $0x10] sm:$0xff]  ;;  %s209_s11 = scalar_lea.vmem [#allocation7], %s432_s5 }
  0x53   : > { %455 = vmatprep.subr.mxu0 %v225_v0  ;;  %v220_v2 = vld [vmem:[%s183_s7] sm:$0xff]  ;;  %v223_v3 = vld [vmem:[#allocation5 + $0x8] sm:$0xff]  ;;  %s318_s19 = scalar_lea.sflag [#allocation4], %s793_s4  ;;  %p883_p4 = scmp.ne.s32.totalorder %s879_s24, 0 }
  0x54   : > { %456 = vmatpush3.msra.mxu0 %v225_v0  ;;  %463 = vmatprep.mubr.msk.f32.mxu0 %vm233_vm0, %v220_v2  ;;  %v222_v4 = vld [vmem:[#allocation5] sm:$0xff]  ;;  %v221_v5 = vld [vmem:[%s183_s7 + $0x8] sm:$0xff]  ;;  %s439_s29 = sshll.u32 (%p883_p4), %s694_s16, 1 }
  0x55   : > { %457 = vmatprep.subr.mxu0 %v224_v1  ;;  %v435_v6 = vld [vmem:[%s873_s2] ss:$0 sm:$0xff]  ;;  %s326_s30 = ssub.s32 (%p883_p4), 3, %s439_s29 }
  0x56   : > { %458 = vmatpush3.msra.mxu0 %v224_v1  ;;  %p327_p13 = scmp.lt.s32.totalorder (%p883_p4), %s326_s30, 2 }
  0x57   : > { %459 = vmatprep.subr.mxu0 %v223_v3 }
  0x58   : > { %460 = vmatpush3.msra.mxu0 %v223_v3 }
  0x59   : > { %461 = vmatprep.subr.mxu0 %v222_v4 }
  0x5a   : > { %462 = vmatpush3.msra.mxu0 %v222_v4 }
  0x5b   : > { %464 = vmatmul.mubr.msk.f32.vlgmr.msra.gmra.mxu0 %vm233_vm0, %v221_v5 }
 0x11b   : > { %v465_v7 = vpop.f32.mrf.mxu0 }
 0x11c   : > { %v312_v8 = vadd.f32 %v465_v7, %v435_v6  ;;  %324 = sbr.rel (!%p883_p4) target bundleno = 316 (0x13c), region = 44 }
 0x11d   : > { %v306_v9 = vpop.f32.mrf.mxu0 }
 0x11e   : > { %316 = vst [vmem:[%s209_s11 + $0x8] sm:$0xff] %v312_v8  ;;  %v307_v10 = vadd.f32 %v435_v6, %v306_v9 }
 0x120   : > { %315 = vst [vmem:[%s209_s11] sm:$0xff] %v307_v10 }
 0x121   : > { %s893_s30 = smov (!%p327_p13, %s326_s30), 2 }
 0x122   : > { %s814_s8 = sshll.u32 %s893_s30, 7 }
 0x123   : > { %s331_s9 = ssub.s32 256, %s814_s8 }
 0x124   : > { %332 = vsyncadd %s318_s19, %s331_s9  ;;  %p441_p5 = scmp.ne.s32.totalorder %s814_s8, 0  ;;  %s448_s10 = sshll.u32 %s694_s16, 8 }
 0x125   : > { %s824_s20 = scalar_lea.hbm %s874_s3, %s448_s10  ;;  %s337_s22 = sshll.u32 %s209_s11, 4  ;;  %s826_s22 = int_to_ptr.vmem [resolvable:$true] %s337_s22 }
 0x126   : > { %s574_s27 = scalar_lea.vmem %s826_s22, %s814_s8  ;;  %s650_s28 = smov [#allocation7]  }
 0x127   : > { %p575_p1 = scmp.ne.s32.totalorder %s826_s22, %s574_s27  ;;  %s578_s5 = sshll.u32 %s650_s28, 4  ;;  %s579_s5 = int_to_ptr.vmem [resolvable:$false] %s578_s5 }
 0x128   : > { %s580_s16 = scalar_lea.vmem %s579_s5, 512  ;;  %p581_p3 = scmp.lt.s32.totalorder %s826_s22, %s579_s5 }
 0x129   : > { %p576_p0 = pnand %p575_p1, %p441_p5  ;;  %p582_p8 = scmp.lt.s32.totalorder %s580_s16, %s574_s27 }
 0x12b   : > { %p577_p7 = pneg %p576_p0  ;;  %p583_p9 = por %p582_p8, %p581_p3 }
 0x12d   : > { %p584_p6 = pnand %p583_p9, %p577_p7 }
 0x12f   : > { %587 = shalt.err (!%p584_p6)
}
 0x130   : > { %s588_s6 = scalar_lea.hbm %s824_s20, %s814_s8  ;;  %s592_s26 = scalar_lea.hbm %s874_s3, 384 }
 0x131   : > { %p589_p11 = scmp.ne.s32.totalorder %s824_s20, %s588_s6  ;;  %p593_p10 = scmp.lt.s32.totalorder %s824_s20, %s874_s3 }
 0x132   : > { %p594_p4 = scmp.lt.s32.totalorder %s592_s26, %s588_s6 }
 0x133   : > { %p590_p12 = pnand %p589_p11, %p441_p5 }
 0x134   : > { %p595_p13 = por %p594_p4, %p593_p10 }
 0x135   : > { %p591_p2 = pneg %p590_p12 }
 0x137   : > { %p596_p1 = pnand %p595_p13, %p591_p2 }
 0x139   : > { %599 = shalt.err (!%p596_p1)
}
 0x13a   : > { %s651_s30 = smov 128   ;;  %s652_s9 = smov 8  }
 0x13b   : > { %343 = dma.vmem_to_hbm [thread:$0]  (%p441_p5), %s826_s22, %s814_s8, %s824_s20, %s318_s19, %s651_s30, %s651_s30, %s652_s9  }
 0x13c PF: > { %s352_s10 = sand.u32 1, %s630_s12   ;;  %p884_p0 = scmp.ne.s32.totalorder %s880_s25, 0 }
 0x13d   : > { %p885_p7 = scmp.ge.s32.totalorder %s642_s15, 2  ;;  %s353_s24 = scalar_lea.sflag [#allocation4], %s352_s10 }
 0x13f   : > { %p477_p3 = pnand %p885_p7, %p884_p0 }
 0x141   : > { %p478_p8 = pneg %p477_p3 }
 0x143   : > { %625 = dma.done.wait (%p478_p8), %s353_s24, 256  }
 0x144   : > { %627 = vsyncadd (%p478_p8), %s353_s24, 4294967040  ;;  %p17_p9 = scmp.ge.s32.totalorder %s698_s18, 4   ;;  %s886_s12 = smov %s634_s13 }
 0x145   : > { %s887_s13 = smov %s638_s14  ;;  %s888_s14 = smov %s710_s21 }
 0x146   : > { %s889_s15 = smov %s698_s18  ;;  %19 = sbr.rel (!%p17_p9) target bundleno = 6 (0x6), region = 81 }
 0x14b   :  { %358 = vsyncpa [#allocation3], 1 }
 0x14c   :  { %360 = vsyncpa [#allocation3 + $0x1], 1 }
 0x14d   :  { %361 = vsyncpa [#allocation6], 1 }
 0x14e   :  { %362 = vsyncpa [#allocation4], 1 }
 0x14f   :  { %364 = vsyncpa [#allocation4 + $0x1], 1 }

// kernel: tpu_custom_call.1
= control target key start
LH: loop header
LB: loop body
LE: loop exit
PB: predicated region body
PF: predicated region fallthrough
CT: control target
= control target key end

     0   :  { %8 = vsyncpa [#allocation3], 0  ;;  %s871_s0 = inlined_call_operand.hbm [shape: f32[20,32], index: 0, kind: input, shape index: {}]   ;;  %s872_s1 = inlined_call_operand.hbm [shape: f32[32,128], index: 1, kind: input, shape index: {}]   ;;  %s873_s2 = inlined_call_operand.vmem [shape: f32[1,128], index: 2, kind: input, shape index: {}]   ;;  %s874_s3 = inlined_call_operand.hbm [shape: f32[20,128], index: 3, kind: output, shape index: {}]  }
   0x1   :  { %10 = vsyncpa [#allocation3 + $0x1], 0 }
   0x2   :  { %11 = vsyncpa [#allocation6], 0 }
   0x3   :  { %12 = vsyncpa [#allocation4], 0 }
   0x4   :  { %14 = vsyncpa [#allocation4 + $0x1], 0  ;;  %s673_s12 = smov 0   ;;  %s675_s13 = smov 0  }
   0x5   :  { %s677_s14 = smov 0   ;;  %s679_s15 = smov 0  }
   0x6 LB: > { %s694_s16 = sadd.s32 4294967295, %s642_s15   ;;  %s420_s17 = sadd.s32 4294967294, %s642_s15   ;;  %s642_s15 = sphi %s679_s15, %s889_s15   ;;  %s638_s14 = sphi %s677_s14, %s888_s14   ;;  %s634_s13 = sphi %s675_s13, %s887_s13   ;;  %s630_s12 = sphi %s673_s12, %s886_s12  }
   0x7   : > { %s698_s18 = sadd.s32 1, %s642_s15   ;;  %s27_s19 = sadd.s32 1, %s638_s14 }
   0x8   : > { %s24_s20 = ssub.s32 %s642_s15, %s698_s18  ;;  %p34_p0 = scmp.ne.s32.totalorder %s638_s14, %s634_s13 }
   0x9   : > { %p25_p1 = scmp.eq.s32.totalorder %s24_s20, 0  ;;  %p35_p2 = scmp.eq.s32.totalorder %s642_s15, 0 }
   0xa   : > { %p40_p3 = scmp.ne.s32.totalorder %s634_s13, %s630_s12  ;;  %p41_p4 = scmp.eq.s32.totalorder %s694_s16, 0 }
   0xb   : > { %s710_s21 = scalar_select %p25_p1, %s638_s14, %s27_s19  }
   0xc   : > { %p712_p5 = por %p35_p2, %p34_p0  ;;  %p718_p6 = por %p41_p4, %p40_p3 }
   0xd   : > { %p106_p7 = scmp.eq.s32.totalorder %s694_s16, 1  ;;  %p112_p8 = scmp.eq.s32.totalorder %s420_s17, 1 }
   0xe   : > { %s878_s23 = scalar_select %p718_p6, 1, 0 }
   0xf   : > { %p421_p9 = scmp.ge.s32.totalorder %s642_s15, 1  ;;  %p119_p10 = scmp.lt.s32.totalorder %s642_s15, 3 }
  0x10   : > { %p725_p11 = por %p106_p7, %p34_p0  ;;  %p729_p12 = por %p112_p8, %p40_p3 }
  0x11   : > { %p733_p13 = pnand %p421_p9, %p119_p10  ;;  %s644_s27 = smov [#allocation5]  }
  0x12   : > { %s879_s24 = scalar_select %p725_p11, 1, 0 }
  0x13   : > { %s880_s25 = scalar_select %p729_p12, 1, 0 }
  0x14   : > { %p472_p1 = pneg %p733_p13  ;;  %s131_s28 = sshll.u32 %s644_s27, 4  ;;  %s132_s28 = int_to_ptr.vmem [resolvable:$true] %s131_s28 }
  0x15   : > { %s533_s29 = scalar_lea.vmem %s132_s28, 512  ;;  %p541_p8 = scmp.lt.s32.totalorder %s132_s28, %s132_s28 }
  0x16   : > { %p473_p2 = pnand %p472_p1, %p41_p4  ;;  %p534_p7 = scmp.ne.s32.totalorder %s132_s28, %s533_s29 }
  0x17   : > { %p542_p6 = scmp.lt.s32.totalorder %s533_s29, %s533_s29 }
  0x18   : > { %p524_p0 = pneg %p473_p2 }
  0x19   : > { %p543_p12 = por %p542_p6, %p541_p8 }
  0x1a   : > { %p536_p11 = pnand %p534_p7, %p524_p0 }
  0x1c   : > { %p537_p3 = pneg %p536_p11 }
  0x1e   : > { %p544_p9 = pnand %p543_p12, %p537_p3 }
  0x20   : > { %547 = shalt.err (!%p544_p9)
}
  0x21   : > { %s645_s30 = smov 128   ;;  %s646_s4 = smov 8  }
  0x22   : > { %475 = dma.hbm_to_vmem [thread:$0]  (!%p473_p2), %s872_s1, 512, %s132_s28, [#allocation6], %s645_s30, %s645_s30, %s646_s4  }
  0x23   : > { %p876_p10 = scmp.ge.s32.totalorder %s642_s15, 2 }
  0x25   : > { %144 = sbr.rel (%p876_p10) target bundleno = 74 (0x4a), region = 24 }
  0x2a   : > { %147 = sbr.rel (!%p712_p5) target bundleno = 74 (0x4a), region = 28  ;;  %s148_s7 = sand.u32 (%p712_p5), 1, %s638_s14  }
  0x2b   : > { %s425_s8 = sshll.u32 (%p712_p5), %s642_s15, 1  ;;  %s424_s9 = sshll.u32 (%p712_p5), %s148_s7, 4 }
  0x2c   : > { %s154_s10 = ssub.s32 (%p712_p5), 3, %s425_s8  ;;  %s754_s19 = scalar_lea.sflag (%p712_p5), [#allocation3], %s148_s7 }
  0x2d   : > { %p155_p6 = scmp.lt.s32.totalorder (%p712_p5), %s154_s10, 2  ;;  %s152_s20 = scalar_lea.vmem (%p712_p5), [#allocation2], %s424_s9 }
  0x2f   : > { %s891_s10 = smov (!%p155_p6, %s154_s10), 2 }
  0x30   : > { %s751_s11 = sshll.u32 %s891_s10, 7 }
  0x31   : > { %s159_s17 = ssub.s32 256, %s751_s11 }
  0x32   : > { %160 = vsyncadd %s754_s19, %s159_s17  ;;  %p427_p5 = scmp.ne.s32.totalorder %s751_s11, 0  ;;  %s447_s22 = sshll.u32 %s642_s15, 8 }
  0x33   : > { %s762_s29 = scalar_lea.hbm %s871_s0, %s447_s22  ;;  %s165_s30 = sshll.u32 %s152_s20, 4  ;;  %s764_s30 = int_to_ptr.vmem [resolvable:$true] %s165_s30 }
  0x34   : > { %s548_s4 = scalar_lea.hbm %s762_s29, %s751_s11  ;;  %s552_s7 = scalar_lea.hbm %s871_s0, 384 }
  0x35   : > { %p549_p11 = scmp.ne.s32.totalorder %s762_s29, %s548_s4  ;;  %p553_p2 = scmp.lt.s32.totalorder %s762_s29, %s871_s0 }
  0x36   : > { %p554_p0 = scmp.lt.s32.totalorder %s552_s7, %s548_s4 }
  0x37   : > { %p550_p12 = pnand %p549_p11, %p427_p5 }
  0x38   : > { %p555_p7 = por %p554_p0, %p553_p2 }
  0x39   : > { %p551_p1 = pneg %p550_p12 }
  0x3b   : > { %p556_p3 = pnand %p555_p7, %p551_p1 }
  0x3d   : > { %559 = shalt.err (!%p556_p3)
}
  0x3e   : > { %s560_s10 = scalar_lea.vmem %s764_s30, %s751_s11  ;;  %s647_s17 = smov [#allocation2]  }
  0x3f   : > { %p561_p8 = scmp.ne.s32.totalorder %s764_s30, %s560_s10  ;;  %s564_s20 = sshll.u32 %s647_s17, 4  ;;  %s565_s20 = int_to_ptr.vmem [resolvable:$false] %s564_s20 }
  0x40   : > { %s566_s22 = scalar_lea.vmem %s565_s20, 512  ;;  %p567_p11 = scmp.lt.s32.totalorder %s764_s30, %s565_s20 }
  0x41   : > { %p562_p9 = pnand %p561_p8, %p427_p5  ;;  %p568_p12 = scmp.lt.s32.totalorder %s566_s22, %s560_s10 }
  0x43   : > { %p563_p6 = pneg %p562_p9  ;;  %p569_p10 = por %p568_p12, %p567_p11 }
  0x45   : > { %p570_p2 = pnand %p569_p10, %p563_p6 }
  0x47   : > { %573 = shalt.err (!%p570_p2)
}
  0x48   : > { %s648_s27 = smov 128   ;;  %s649_s28 = smov 8  }
  0x49   : > { %171 = dma.hbm_to_vmem [thread:$0]  (%p427_p5), %s762_s29, %s751_s11, %s764_s30, %s754_s19, %s648_s27, %s648_s27, %s649_s28  }
  0x4a PF: > { %177 = sbr.rel (%p733_p13) target bundleno = 316 (0x13c), region = 32  ;;  %s793_s4 = sand.u32 (!%p733_p13), 1, %s634_s13  }
  0x4b   : > { %s432_s5 = sshll.u32 (!%p733_p13), %s793_s4, 4  ;;  %s180_s6 = scalar_lea.sflag (!%p733_p13), [#allocation3], %s793_s4 }
  0x4c   : > { %s183_s7 = scalar_lea.vmem (!%p733_p13), [#allocation2], %s432_s5  ;;  %p882_p10 = scmp.ne.s32.totalorder (!%p733_p13), %s878_s23, 0 }
  0x4f   : > { %617 = dma.done.wait (%p882_p10), %s180_s6, 256  }
  0x50   : > { %619 = vsyncadd (%p882_p10), %s180_s6, 4294967040 }
  0x51   : > { %621 = dma.done.wait (%p41_p4), [#allocation6], 512  }
  0x52   : > { %623 = vsyncadd (%p41_p4), [#allocation6], 4294966784  ;;  %vm233_vm0 = vcmask 261120   ;;  %v225_v0 = vld [vmem:[#allocation5 + $0x18] sm:$0xff]  ;;  %v224_v1 = vld [vmem:[#allocation5 + $0x10] sm:$0xff]  ;;  %s209_s11 = scalar_lea.vmem [#allocation7], %s432_s5 }
  0x53   : > { %455 = vmatprep.subr.mxu0 %v225_v0  ;;  %v220_v2 = vld [vmem:[%s183_s7] sm:$0xff]  ;;  %v223_v3 = vld [vmem:[#allocation5 + $0x8] sm:$0xff]  ;;  %s318_s19 = scalar_lea.sflag [#allocation4], %s793_s4  ;;  %p883_p4 = scmp.ne.s32.totalorder %s879_s24, 0 }
  0x54   : > { %456 = vmatpush3.msra.mxu0 %v225_v0  ;;  %463 = vmatprep.mubr.msk.f32.mxu0 %vm233_vm0, %v220_v2  ;;  %v222_v4 = vld [vmem:[#allocation5] sm:$0xff]  ;;  %v221_v5 = vld [vmem:[%s183_s7 + $0x8] sm:$0xff]  ;;  %s439_s29 = sshll.u32 (%p883_p4), %s694_s16, 1 }
  0x55   : > { %457 = vmatprep.subr.mxu0 %v224_v1  ;;  %v435_v6 = vld [vmem:[%s873_s2] ss:$0 sm:$0xff]  ;;  %s326_s30 = ssub.s32 (%p883_p4), 3, %s439_s29 }
  0x56   : > { %458 = vmatpush3.msra.mxu0 %v224_v1  ;;  %p327_p13 = scmp.lt.s32.totalorder (%p883_p4), %s326_s30, 2 }
  0x57   : > { %459 = vmatprep.subr.mxu0 %v223_v3 }
  0x58   : > { %460 = vmatpush3.msra.mxu0 %v223_v3 }
  0x59   : > { %461 = vmatprep.subr.mxu0 %v222_v4 }
  0x5a   : > { %462 = vmatpush3.msra.mxu0 %v222_v4 }
  0x5b   : > { %464 = vmatmul.mubr.msk.f32.vlgmr.msra.gmra.mxu0 %vm233_vm0, %v221_v5 }
 0x11b   : > { %v465_v7 = vpop.f32.mrf.mxu0 }
 0x11c   : > { %v312_v8 = vadd.f32 %v465_v7, %v435_v6  ;;  %324 = sbr.rel (!%p883_p4) target bundleno = 316 (0x13c), region = 44 }
 0x11d   : > { %v306_v9 = vpop.f32.mrf.mxu0 }
 0x11e   : > { %316 = vst [vmem:[%s209_s11 + $0x8] sm:$0xff] %v312_v8  ;;  %v307_v10 = vadd.f32 %v435_v6, %v306_v9 }
 0x120   : > { %315 = vst [vmem:[%s209_s11] sm:$0xff] %v307_v10 }
 0x121   : > { %s893_s30 = smov (!%p327_p13, %s326_s30), 2 }
 0x122   : > { %s814_s8 = sshll.u32 %s893_s30, 7 }
 0x123   : > { %s331_s9 = ssub.s32 256, %s814_s8 }
 0x124   : > { %332 = vsyncadd %s318_s19, %s331_s9  ;;  %p441_p5 = scmp.ne.s32.totalorder %s814_s8, 0  ;;  %s448_s10 = sshll.u32 %s694_s16, 8 }
 0x125   : > { %s824_s20 = scalar_lea.hbm %s874_s3, %s448_s10  ;;  %s337_s22 = sshll.u32 %s209_s11, 4  ;;  %s826_s22 = int_to_ptr.vmem [resolvable:$true] %s337_s22 }
 0x126   : > { %s574_s27 = scalar_lea.vmem %s826_s22, %s814_s8  ;;  %s650_s28 = smov [#allocation7]  }
 0x127   : > { %p575_p1 = scmp.ne.s32.totalorder %s826_s22, %s574_s27  ;;  %s578_s5 = sshll.u32 %s650_s28, 4  ;;  %s579_s5 = int_to_ptr.vmem [resolvable:$false] %s578_s5 }
 0x128   : > { %s580_s16 = scalar_lea.vmem %s579_s5, 512  ;;  %p581_p3 = scmp.lt.s32.totalorder %s826_s22, %s579_s5 }
 0x129   : > { %p576_p0 = pnand %p575_p1, %p441_p5  ;;  %p582_p8 = scmp.lt.s32.totalorder %s580_s16, %s574_s27 }
 0x12b   : > { %p577_p7 = pneg %p576_p0  ;;  %p583_p9 = por %p582_p8, %p581_p3 }
 0x12d   : > { %p584_p6 = pnand %p583_p9, %p577_p7 }
 0x12f   : > { %587 = shalt.err (!%p584_p6)
}
 0x130   : > { %s588_s6 = scalar_lea.hbm %s824_s20, %s814_s8  ;;  %s592_s26 = scalar_lea.hbm %s874_s3, 384 }
 0x131   : > { %p589_p11 = scmp.ne.s32.totalorder %s824_s20, %s588_s6  ;;  %p593_p10 = scmp.lt.s32.totalorder %s824_s20, %s874_s3 }
 0x132   : > { %p594_p4 = scmp.lt.s32.totalorder %s592_s26, %s588_s6 }
 0x133   : > { %p590_p12 = pnand %p589_p11, %p441_p5 }
 0x134   : > { %p595_p13 = por %p594_p4, %p593_p10 }
 0x135   : > { %p591_p2 = pneg %p590_p12 }
 0x137   : > { %p596_p1 = pnand %p595_p13, %p591_p2 }
 0x139   : > { %599 = shalt.err (!%p596_p1)
}
 0x13a   : > { %s651_s30 = smov 128   ;;  %s652_s9 = smov 8  }
 0x13b   : > { %343 = dma.vmem_to_hbm [thread:$0]  (%p441_p5), %s826_s22, %s814_s8, %s824_s20, %s318_s19, %s651_s30, %s651_s30, %s652_s9  }
 0x13c PF: > { %s352_s10 = sand.u32 1, %s630_s12   ;;  %p884_p0 = scmp.ne.s32.totalorder %s880_s25, 0 }
 0x13d   : > { %p885_p7 = scmp.ge.s32.totalorder %s642_s15, 2  ;;  %s353_s24 = scalar_lea.sflag [#allocation4], %s352_s10 }
 0x13f   : > { %p477_p3 = pnand %p885_p7, %p884_p0 }
 0x141   : > { %p478_p8 = pneg %p477_p3 }
 0x143   : > { %625 = dma.done.wait (%p478_p8), %s353_s24, 256  }
 0x144   : > { %627 = vsyncadd (%p478_p8), %s353_s24, 4294967040  ;;  %p17_p9 = scmp.ge.s32.totalorder %s698_s18, 4   ;;  %s886_s12 = smov %s634_s13 }
 0x145   : > { %s887_s13 = smov %s638_s14  ;;  %s888_s14 = smov %s710_s21 }
 0x146   : > { %s889_s15 = smov %s698_s18  ;;  %19 = sbr.rel (!%p17_p9) target bundleno = 6 (0x6), region = 81 }
 0x14b   :  { %358 = vsyncpa [#allocation3], 1 }
 0x14c   :  { %360 = vsyncpa [#allocation3 + $0x1], 1 }
 0x14d   :  { %361 = vsyncpa [#allocation6], 1 }
 0x14e   :  { %362 = vsyncpa [#allocation4], 1 }
 0x14f   :  { %364 = vsyncpa [#allocation4 + $0x1], 1 }

</bundles_post_ra>
